<compile_context>
chip_gen: v6e
topology: v6e:2x2x1
jax: 0.10.0
libtpu: 0.0.40
codegen_flags: <defaults>
</compile_context>

<pallas_src>
import jax
import jax.numpy as jnp
from jax.experimental import pallas as pl
from jax.experimental.pallas import tpu as pltpu

LANE = 128  # lane-dense padded width for all layer outputs


def _round_up(n, m):
    return ((n + m - 1) // m) * m


def motor_control_kernel(x_ref, w1_ref, b1_ref, w23_ref, b23_ref, o_ref):
    # Cast the f32 input tile to bf16 in VMEM (avoids a separate HBM cast pass).
    xb = x_ref[...].astype(jnp.bfloat16)
    # fc1 + ReLU  (bf16 operands, f32 accumulation on the MXU)
    h1 = jnp.dot(xb, w1_ref[...], preferred_element_type=jnp.float32)
    h1 = jnp.maximum(h1 + b1_ref[...], 0.0)                       # (tm, 128)
    # fused fc2.fc3  (W23 = W2 @ W3, b23 = b2 @ W3 + b3 ; exact composition)
    o4 = jnp.dot(h1.astype(jnp.bfloat16), w23_ref[...],
                 preferred_element_type=jnp.float32)
    o4 = o4 + b23_ref[...]                                        # (tm, 128)
    # sigmoid(o4) + tanh(o4); sigmoid via exact tanh identity -> EUP only, no divide.
    o_ref[...] = (0.5 * jnp.tanh(0.5 * o4) + 0.5 + jnp.tanh(o4)).astype(o_ref.dtype)


def prepare_params(w1, b1, w2, b2, w3, b3):
    """One-time parameter prep (hoisted out of the per-call path).

    Folds fc2.fc3 in f32, pads every layer-output dim to 128 lanes, casts weights
    to bf16 (biases stay f32)."""
    w23 = w2.astype(jnp.float32) @ w3.astype(jnp.float32)                 # (64, 10)
    b23 = b2.astype(jnp.float32) @ w3.astype(jnp.float32) + b3.astype(jnp.float32)

    def pad2(a, rows, cols, dtype):
        out = jnp.zeros((rows, cols), dtype)
        return out.at[: a.shape[0], : a.shape[1]].set(a.astype(dtype))

    w1p = pad2(w1, 256, LANE, jnp.bfloat16)                               # (256, 128)
    w23p = pad2(w23, LANE, LANE, jnp.bfloat16)                            # (128, 128)
    b1p = pad2(b1.reshape(1, -1), 1, LANE, jnp.float32)                   # (1, 128)
    b23p = pad2(b23.reshape(1, -1), 1, LANE, jnp.float32)                 # (1, 128)
    return w1p, b1p, w23p, b23p


def motor_control_forward(x, w1p, b1p, w23p, b23p, *, num_classes=10, tm=1024):
    """x: [B, 256] f32 ; padded params from prepare_params().  Returns [B, 10] f32."""
    B, d_in = x.shape
    assert d_in == 256

    # Row tile: multiple of 16 (bf16 sublane packing); cap so the grid has >= 2 steps
    # when possible so the "parallel" axis can use both v7x TensorCores.  No jnp.pad:
    # the last partial block is clamped by Pallas (masked writeback), extra rows are
    # never read back.
    tm_cap = max(16, _round_up(-(-B // 2), 16))
    tm_eff = max(16, min(tm, tm_cap))
    grid = (pl.cdiv(B, tm_eff),)

    flops = 2 * B * (d_in * LANE + LANE * LANE)
    bytes_accessed = (x.size * 4 + B * LANE * 2
                      + (w1p.size + w23p.size) * 2 + (b1p.size + b23p.size) * 4)

    # NOTE: weight/bias blocks are grid-invariant; pipeline_mode=pl.Buffered(1) would
    # save ~0.2 MB of VMEM but is a minor win, so it is omitted for portable lowering.
    out_padded = pl.pallas_call(
        motor_control_kernel,
        out_shape=jax.ShapeDtypeStruct((B, LANE), jnp.bfloat16),
        grid_spec=pltpu.PrefetchScalarGridSpec(
            num_scalar_prefetch=0,
            grid=grid,
            in_specs=[
                pl.BlockSpec((tm_eff, d_in), lambda i: (i, 0)),   # x tile (f32, cast in-kernel)
                pl.BlockSpec((d_in, LANE), lambda i: (0, 0)),     # W1 (resident)
                pl.BlockSpec((1, LANE), lambda i: (0, 0)),        # b1
                pl.BlockSpec((LANE, LANE), lambda i: (0, 0)),     # W2 @ W3 (fused, resident)
                pl.BlockSpec((1, LANE), lambda i: (0, 0)),        # b2 @ W3 + b3 (fused)
            ],
            out_specs=pl.BlockSpec((tm_eff, LANE), lambda i: (i, 0)),  # lane-dense bf16 out
        ),
        compiler_params=pltpu.CompilerParams(
            dimension_semantics=("parallel",),           # shardable across v7x's 2 TCs
            vmem_limit_bytes=32 * 1024 * 1024,           # explicit; safe on v5e/v6e/v7x
        ),
        cost_estimate=pl.CostEstimate(
            flops=flops, transcendentals=2 * B * LANE, bytes_accessed=bytes_accessed),
    )(x.astype(jnp.float32), w1p, b1p, w23p, b23p)

    return out_padded[:, :num_classes].astype(jnp.float32)


def init_params(key):
    """PyTorch nn.Linear-style init; weights stored transposed as [in, out]."""
    def linear(k, fan_in, fan_out):
        kw, kb = jax.random.split(k)
        bound = 1.0 / (fan_in ** 0.5)
        w = jax.random.uniform(kw, (fan_in, fan_out), jnp.float32, -bound, bound)
        b = jax.random.uniform(kb, (fan_out,), jnp.float32, -bound, bound)
        return w, b

    k1, k2, k3 = jax.random.split(key, 3)
    w1, b1 = linear(k1, 256, 64)
    w2, b2 = linear(k2, 64, 32)
    w3, b3 = linear(k3, 32, 10)
    return w1, b1, w2, b2, w3, b3


if __name__ == "__main__":
    key = jax.random.PRNGKey(0)
    kx, kp = jax.random.split(key)

    # Small, non-power-of-two batch: exercises the 16-aligned tiling, the >=2-step grid
    # split, and the partial last block (rows 32..49 of block 1 valid, rest masked).
    B = 50
    x = jax.random.normal(kx, (B, 256), jnp.float32)
    params = init_params(kp)

    padded = prepare_params(*params)
    out = motor_control_forward(x, *padded)
    out = jax.block_until_ready(out)

    # Pure-JAX f32 reference of the PyTorch forward.
    w1, b1, w2, b2, w3, b3 = params
    o1 = x @ w1 + b1
    o2 = jnp.maximum(o1, 0.0)
    o3 = o2 @ w2 + b2
    o4 = o3 @ w3 + b3
    ref = jax.nn.sigmoid(o4) + jnp.tanh(o4)

    assert out.shape == (B, 10)
    # bf16 weights / activations / output -> loosened tolerance vs. the f32 reference.
    err = float(jnp.max(jnp.abs(out - ref)))
    assert jnp.allclose(out, ref, atol=3e-2, rtol=3e-2), err

    print("KERNEL_OK")
</pallas_src>

<mosaic_0001>
module attributes {stable_mosaic.version = 11 : i64} {
  func.func @motor_control_kernel(%arg0: i32, %arg1: memref<32x256xf32, #tpu.memory_space<vmem>>, %arg2: memref<256x128xbf16, #tpu.memory_space<vmem>>, %arg3: memref<1x128xf32, #tpu.memory_space<vmem>>, %arg4: memref<128x128xbf16, #tpu.memory_space<vmem>>, %arg5: memref<1x128xf32, #tpu.memory_space<vmem>>, %arg6: memref<32x128xbf16, #tpu.memory_space<vmem>>) attributes {dimension_semantics = [#tpu.dimension_semantics<parallel>], iteration_bounds = array<i64: 2>, scalar_prefetch = 0 : i64, scratch_operands = 0 : i64, tpu.core_type = #tpu.core_type<tc>, window_params = [{transform_indices = @transform_0, window_bounds = array<i64: 32, 256>}, {pipeline_mode = #tpu.pipeline_mode<synchronous>, transform_indices = @transform_1, window_bounds = array<i64: 256, 128>}, {pipeline_mode = #tpu.pipeline_mode<synchronous>, transform_indices = @transform_2, window_bounds = array<i64: 1, 128>}, {pipeline_mode = #tpu.pipeline_mode<synchronous>, transform_indices = @transform_3, window_bounds = array<i64: 128, 128>}, {pipeline_mode = #tpu.pipeline_mode<synchronous>, transform_indices = @transform_4, window_bounds = array<i64: 1, 128>}, {transform_indices = @transform_5, window_bounds = array<i64: 32, 128>}]} {
    %c0 = arith.constant 0 : index
    %c0_0 = arith.constant 0 : index
    %0 = vector.load %arg1[%c0, %c0_0] : memref<32x256xf32, #tpu.memory_space<vmem>>, vector<32x256xf32>
    %1 = arith.truncf %0 : vector<32x256xf32> to vector<32x256xbf16>
    %c0_1 = arith.constant 0 : index
    %c0_2 = arith.constant 0 : index
    %2 = vector.load %arg2[%c0_1, %c0_2] : memref<256x128xbf16, #tpu.memory_space<vmem>>, vector<256x128xbf16>
    %cst = arith.constant dense<0.000000e+00> : vector<32x128xf32>
    %3 = tpu.matmul %1, %2, %cst {dimension_numbers = #tpu.dot_dimension_numbers<[1], [0], [0], [1], [0, 0, 1, 1], [], []>} : vector<32x256xbf16>, vector<256x128xbf16>, vector<32x128xf32> -> vector<32x128xf32>
    %c0_3 = arith.constant 0 : index
    %c0_4 = arith.constant 0 : index
    %4 = vector.load %arg3[%c0_3, %c0_4] : memref<1x128xf32, #tpu.memory_space<vmem>>, vector<1x128xf32>
    %5 = vector.broadcast %4 : vector<1x128xf32> to vector<32x128xf32>
    %6 = arith.addf %3, %5 : vector<32x128xf32>
    %cst_5 = arith.constant 0.000000e+00 : f32
    %7 = vector.broadcast %cst_5 : f32 to vector<32x128xf32>
    %8 = arith.maximumf %6, %7 : vector<32x128xf32>
    %9 = arith.truncf %8 : vector<32x128xf32> to vector<32x128xbf16>
    %c0_6 = arith.constant 0 : index
    %c0_7 = arith.constant 0 : index
    %10 = vector.load %arg4[%c0_6, %c0_7] : memref<128x128xbf16, #tpu.memory_space<vmem>>, vector<128x128xbf16>
    %cst_8 = arith.constant dense<0.000000e+00> : vector<32x128xf32>
    %11 = tpu.matmul %9, %10, %cst_8 {dimension_numbers = #tpu.dot_dimension_numbers<[1], [0], [0], [1], [0, 0, 1, 1], [], []>} : vector<32x128xbf16>, vector<128x128xbf16>, vector<32x128xf32> -> vector<32x128xf32>
    %c0_9 = arith.constant 0 : index
    %c0_10 = arith.constant 0 : index
    %12 = vector.load %arg5[%c0_9, %c0_10] : memref<1x128xf32, #tpu.memory_space<vmem>>, vector<1x128xf32>
    %13 = vector.broadcast %12 : vector<1x128xf32> to vector<32x128xf32>
    %14 = arith.addf %11, %13 : vector<32x128xf32>
    %cst_11 = arith.constant 5.000000e-01 : f32
    %15 = vector.broadcast %cst_11 : f32 to vector<32x128xf32>
    %16 = arith.mulf %15, %14 : vector<32x128xf32>
    %17 = math.tanh %16 : vector<32x128xf32>
    %cst_12 = arith.constant 5.000000e-01 : f32
    %18 = vector.broadcast %cst_12 : f32 to vector<32x128xf32>
    %19 = arith.mulf %18, %17 : vector<32x128xf32>
    %cst_13 = arith.constant 5.000000e-01 : f32
    %20 = vector.broadcast %cst_13 : f32 to vector<32x128xf32>
    %21 = arith.addf %19, %20 : vector<32x128xf32>
    %22 = math.tanh %14 : vector<32x128xf32>
    %23 = arith.addf %21, %22 : vector<32x128xf32>
    %24 = arith.truncf %23 : vector<32x128xf32> to vector<32x128xbf16>
    %c0_14 = arith.constant 0 : index
    %c0_15 = arith.constant 0 : index
    %25 = vector.load %arg6[%c0_14, %c0_15] : memref<32x128xbf16, #tpu.memory_space<vmem>>, vector<32x128xbf16>
    tpu.vector_store %arg6[%c0_14, %c0_15], %24 {strides = array<i32>} : memref<32x128xbf16, #tpu.memory_space<vmem>>, vector<32x128xbf16>,
    return
  }
  func.func @transform_0(%arg0: i32) -> (i32, i32) {
    %c0_i32 = arith.constant 0 : i32
    %c0_i32_0 = arith.constant 0 : i32
    return %arg0, %c0_i32 : i32, i32
  }
  func.func @transform_1(%arg0: i32) -> (i32, i32) {
    %c0_i32 = arith.constant 0 : i32
    %c0_i32_0 = arith.constant 0 : i32
    %c0_i32_1 = arith.constant 0 : i32
    return %c0_i32, %c0_i32_0 : i32, i32
  }
  func.func @transform_2(%arg0: i32) -> (i32, i32) {
    %c0_i32 = arith.constant 0 : i32
    %c0_i32_0 = arith.constant 0 : i32
    %c0_i32_1 = arith.constant 0 : i32
    return %c0_i32, %c0_i32_0 : i32, i32
  }
  func.func @transform_3(%arg0: i32) -> (i32, i32) {
    %c0_i32 = arith.constant 0 : i32
    %c0_i32_0 = arith.constant 0 : i32
    %c0_i32_1 = arith.constant 0 : i32
    return %c0_i32, %c0_i32_0 : i32, i32
  }
  func.func @transform_4(%arg0: i32) -> (i32, i32) {
    %c0_i32 = arith.constant 0 : i32
    %c0_i32_0 = arith.constant 0 : i32
    %c0_i32_1 = arith.constant 0 : i32
    return %c0_i32, %c0_i32_0 : i32, i32
  }
  func.func @transform_5(%arg0: i32) -> (i32, i32) {
    %c0_i32 = arith.constant 0 : i32
    %c0_i32_0 = arith.constant 0 : i32
    return %arg0, %c0_i32 : i32, i32
  }
}

</mosaic_0001>

<bundles_post_ra>
// kernel: tpu_custom_call.1
= control target key start
LH: loop header
LB: loop body
LE: loop exit
PB: predicated region body
PF: predicated region fallthrough
CT: control target
= control target key end

     0   :  { %10 = vsyncpa [#allocation3], 0  ;;  %s1428_s0 = inlined_call_operand.hbm [shape: f32[50,256], index: 0, kind: input, shape index: {}]   ;;  %s1429_s1 = inlined_call_operand.hbm [shape: bf16[256,128], index: 1, kind: input, shape index: {}]   ;;  %s1430_s2 = inlined_call_operand.vmem [shape: f32[1,128], index: 2, kind: input, shape index: {}]   ;;  %s1431_s3 = inlined_call_operand.hbm [shape: bf16[128,128], index: 3, kind: input, shape index: {}]   ;;  %s1432_s4 = inlined_call_operand.vmem [shape: f32[1,128], index: 4, kind: input, shape index: {}]   ;;  %s1433_s5 = inlined_call_operand.hbm [shape: bf16[50,128], index: 5, kind: output, shape index: {}]  }
   0x1   :  { %12 = vsyncpa [#allocation3 + $0x1], 0 }
   0x2   :  { %13 = vsyncpa [#allocation6], 0 }
   0x3   :  { %14 = vsyncpa [#allocation4], 0 }
   0x4   :  { %16 = vsyncpa [#allocation4 + $0x1], 0  ;;  %s1199_s18 = smov 0   ;;  %s1201_s19 = smov 0  }
   0x5   :  { %s1203_s20 = smov 0   ;;  %s1205_s21 = smov 0  }
   0x6 LB: > { %s1220_s22 = sadd.s32 4294967295, %s1157_s21   ;;  %s770_s23 = sadd.s32 4294967294, %s1157_s21   ;;  %s1157_s21 = sphi %s1205_s21, %s1450_s21   ;;  %s1153_s20 = sphi %s1203_s20, %s1449_s20   ;;  %s1149_s19 = sphi %s1201_s19, %s1448_s19   ;;  %s1145_s18 = sphi %s1199_s18, %s1447_s18  }
   0x7   : > { %s1224_s24 = sadd.s32 1, %s1157_s21   ;;  %s29_s25 = sadd.s32 1, %s1153_s20 }
   0x8   : > { %s26_s26 = ssub.s32 %s1157_s21, %s1224_s24  ;;  %p36_p0 = scmp.ne.s32.totalorder %s1153_s20, %s1149_s19 }
   0x9   : > { %p27_p1 = scmp.eq.s32.totalorder %s26_s26, 0  ;;  %p37_p2 = scmp.eq.s32.totalorder %s1157_s21, 0 }
   0xa   : > { %p42_p3 = scmp.ne.s32.totalorder %s1149_s19, %s1145_s18  ;;  %p1434_p4 = scmp.eq.s32.totalorder %s1220_s22, 0 }
   0xb   : > { %s1236_s27 = scalar_select %p27_p1, %s1153_s20, %s29_s25  }
   0xc   : > { %p1238_p5 = por %p37_p2, %p36_p0  ;;  %p1244_p6 = por %p1434_p4, %p42_p3 }
   0xd   : > { %p150_p7 = scmp.eq.s32.totalorder %s1220_s22, 1  ;;  %p156_p8 = scmp.eq.s32.totalorder %s770_s23, 1 }
   0xe   : > { %s1437_s29 = scalar_select %p1244_p6, 1, 0 }
   0xf   : > { %p771_p9 = scmp.ge.s32.totalorder %s1157_s21, 1  ;;  %p163_p10 = scmp.lt.s32.totalorder %s1157_s21, 3 }
  0x10   : > { %p1251_p11 = por %p150_p7, %p36_p0  ;;  %p1255_p12 = por %p156_p8, %p42_p3 }
  0x11   : > { %p1259_p13 = pnand %p771_p9, %p163_p10  ;;  %s1159_s8 = smov [#allocation5]  }
  0x12   : > { %s1438_s30 = scalar_select %p1251_p11, 1, 0 }
  0x13   : > { %s1439_s6 = scalar_select %p1255_p12, 1, 0 }
  0x14   : > { %p915_p1 = pneg %p1259_p13  ;;  %s175_s9 = sshll.u32 %s1159_s8, 4  ;;  %s176_s9 = int_to_ptr.vmem [resolvable:$true] %s175_s9 }
  0x15   : > { %s1160_s11 = smov [#allocation7]   ;;  %s1022_s13 = scalar_lea.vmem %s176_s9, 2048 }
  0x16   : > { %p1267_p2 = pnand %p915_p1, %p1434_p4  ;;  %s191_s12 = sshll.u32 %s1160_s11, 4  ;;  %s192_s12 = int_to_ptr.vmem [resolvable:$true] %s191_s12 }
  0x17   : > { %p1023_p3 = scmp.ne.s32.totalorder %s176_s9, %s1022_s13  ;;  %p1030_p9 = scmp.lt.s32.totalorder %s176_s9, %s176_s9 }
  0x18   : > { %p1013_p0 = pneg %p1267_p2  ;;  %p1031_p10 = scmp.lt.s32.totalorder %s1022_s13, %s1022_s13 }
  0x1a   : > { %p1025_p7 = pnand %p1023_p3, %p1013_p0  ;;  %p1032_p12 = por %p1031_p10, %p1030_p9 }
  0x1c   : > { %p1026_p8 = pneg %p1025_p7 }
  0x1e   : > { %p1033_p1 = pnand %p1032_p12, %p1026_p8 }
  0x20   : > { %1036 = shalt.err (!%p1033_p1)
}
  0x21   : > { %s1161_s14 = smov 64   ;;  %s1162_s15 = smov 4  }
  0x22   : > { %918 = dma.hbm_to_vmem [thread:$0]  (!%p1267_p2), %s1429_s1, 2048, %s176_s9, [#allocation6], %s1161_s14, %s1161_s14, %s1162_s15  }
  0x23   : > { %s1048_s23 = scalar_lea.vmem %s192_s12, 1024  ;;  %p1056_p11 = scmp.lt.s32.totalorder %s192_s12, %s192_s12 }
  0x24   : > { %p1049_p4 = scmp.ne.s32.totalorder %s192_s12, %s1048_s23  ;;  %p1057_p6 = scmp.lt.s32.totalorder %s1048_s23, %s1048_s23 }
  0x26   : > { %p1051_p3 = pnand %p1049_p4, %p1013_p0  ;;  %p1058_p9 = por %p1057_p6, %p1056_p11 }
  0x28   : > { %p1052_p7 = pneg %p1051_p3 }
  0x2a   : > { %p1059_p12 = pnand %p1058_p9, %p1052_p7 }
  0x2c   : > { %1062 = shalt.err (!%p1059_p12)
}
  0x2d   : > { %921 = dma.hbm_to_vmem [thread:$0]  (!%p1267_p2), %s1431_s3, 1024, %s192_s12, [#allocation6], %s1161_s14, %s1161_s14, %s1162_s15  }
  0x2e   : > { %p774_p8 = scmp.ge.s32.totalorder %s1157_s21, 2 }
  0x30   : > { %204 = sbr.rel (%p774_p8) target bundleno = 85 (0x55), region = 32 }
  0x35   : > { %207 = sbr.rel (!%p1238_p5) target bundleno = 85 (0x55), region = 36  ;;  %s208_s8 = sand.u32 (%p1238_p5), 1, %s1153_s20  }
  0x36   : > { %s776_s9 = sshll.u32 (%p1238_p5), %s1157_s21, 2  ;;  %s775_s11 = sshll.u32 (%p1238_p5), %s208_s8, 6 }
  0x37   : > { %s214_s13 = ssub.s32 (%p1238_p5), 7, %s776_s9  ;;  %s1299_s14 = scalar_lea.sflag (%p1238_p5), [#allocation3], %s208_s8 }
  0x38   : > { %p215_p4 = scmp.lt.s32.totalorder (%p1238_p5), %s214_s13, 4  ;;  %s212_s15 = scalar_lea.vmem (%p1238_p5), [#allocation2], %s775_s11 }
  0x3a   : > { %s1452_s13 = smov (!%p215_p4, %s214_s13), 4 }
  0x3b   : > { %s1296_s10 = sshll.u32 %s1452_s13, 8 }
  0x3c   : > { %s220_s12 = ssub.s32 1024, %s1296_s10 }
  0x3d   : > { %221 = vsyncadd %s1299_s14, %s220_s12  ;;  %p779_p5 = scmp.ne.s32.totalorder %s1296_s10, 0  ;;  %s830_s28 = sshll.u32 %s1157_s21, 10 }
  0x3e   : > { %s1307_s23 = scalar_lea.hbm %s1428_s0, %s830_s28  ;;  %s227_s25 = sshll.u32 %s212_s15, 4  ;;  %s1309_s25 = int_to_ptr.vmem [resolvable:$true] %s227_s25 }
  0x3f   : > { %s1063_s26 = scalar_lea.hbm %s1307_s23, %s1296_s10  ;;  %s1067_s11 = scalar_lea.hbm %s1428_s0, 1792 }
  0x40   : > { %p1064_p6 = scmp.ne.s32.totalorder %s1307_s23, %s1063_s26  ;;  %p1068_p0 = scmp.lt.s32.totalorder %s1307_s23, %s1428_s0 }
  0x41   : > { %p1069_p10 = scmp.lt.s32.totalorder %s1067_s11, %s1063_s26 }
  0x42   : > { %p1065_p11 = pnand %p1064_p6, %p779_p5 }
  0x43   : > { %p1070_p1 = por %p1069_p10, %p1068_p0 }
  0x44   : > { %p1066_p2 = pneg %p1065_p11 }
  0x46   : > { %p1071_p3 = pnand %p1070_p1, %p1066_p2 }
  0x48   : > { %1074 = shalt.err (!%p1071_p3)
}
  0x49   : > { %s1075_s15 = scalar_lea.vmem %s1309_s25, %s1296_s10  ;;  %s1163_s28 = smov [#allocation2]  }
  0x4a   : > { %p1076_p7 = scmp.ne.s32.totalorder %s1309_s25, %s1075_s15  ;;  %s1079_s16 = sshll.u32 %s1163_s28, 4  ;;  %s1080_s16 = int_to_ptr.vmem [resolvable:$false] %s1079_s16 }
  0x4b   : > { %s1081_s17 = scalar_lea.vmem %s1080_s16, 2048  ;;  %p1082_p4 = scmp.lt.s32.totalorder %s1309_s25, %s1080_s16 }
  0x4c   : > { %p1077_p9 = pnand %p1076_p7, %p779_p5  ;;  %p1083_p6 = scmp.lt.s32.totalorder %s1081_s17, %s1075_s15 }
  0x4e   : > { %p1078_p12 = pneg %p1077_p9  ;;  %p1084_p11 = por %p1083_p6, %p1082_p4 }
  0x50   : > { %p1085_p0 = pnand %p1084_p11, %p1078_p12 }
  0x52   : > { %1088 = shalt.err (!%p1085_p0)
}
  0x53   : > { %s1164_s26 = smov 256   ;;  %s1165_s8 = smov 16  }
  0x54   : > { %233 = dma.hbm_to_vmem [thread:$0]  (%p779_p5), %s1307_s23, %s1296_s10, %s1309_s25, %s1299_s14, %s1164_s26, %s1164_s26, %s1165_s8  }
  0x55 PF: > { %239 = sbr.rel (%p1259_p13) target bundleno = 595 (0x253), region = 40  ;;  %s1338_s9 = sand.u32 (!%p1259_p13), 1, %s1149_s19  }
  0x56   : > { %s785_s11 = sshll.u32 (!%p1259_p13), %s1338_s9, 6  ;;  %s242_s13 = scalar_lea.sflag (!%p1259_p13), [#allocation3], %s1338_s9 }
  0x57   : > { %s1342_s12 = scalar_lea.vmem (!%p1259_p13), [#allocation2], %s785_s11  ;;  %p1442_p2 = scmp.ne.s32.totalorder (!%p1259_p13), %s1437_s29, 0 }
  0x5a   : > { %1132 = dma.done.wait (%p1442_p2), %s242_s13, 1024  }
  0x5b   : > { %1134 = vsyncadd (%p1442_p2), %s242_s13, 4294966272  ;;  %p1443_p5 = scmp.eq.s32.totalorder %s1220_s22, 0 }
  0x5d   : > { %1136 = dma.done.wait (%p1443_p5), [#allocation6], 3072   ;;  %p1444_p13 = pmov %p1443_p5 }
  0x5e   : > { %v971_v0 = vld [vmem:[#allocation5 + $0x78] sm:$0xff]   ;;  %v973_v2 = vld [vmem:[#allocation5 + $0x70] sm:$0xff]   ;;  %v975_v4 = vld [vmem:[#allocation5 + $0x68] sm:$0xff]   ;;  %s788_s23 = sshll.u32 %s1338_s9, 4  ;;  %s659_s15 = scalar_lea.sflag [#allocation4], %s1338_s9 }
  0x5f   : > { %1138 = vsyncadd (%p1444_p13), [#allocation6], 4294964224  ;;  %v972_v1 = vld [vmem:[#allocation5 + $0x38] sm:$0xff]   ;;  %847 = vmatprep.subr.bf16.mxu0 %v971_v0  ;;  %v974_v3 = vld [vmem:[#allocation5 + $0x30] sm:$0xff]   ;;  %s279_s25 = scalar_lea.vmem [#allocation8], %s788_s23  ;;  %p1445_p10 = scmp.ne.s32.totalorder %s1438_s30, 0 }
  0x60   : > { %848 = vmatpush3.bf16.msra.mxu0 %v972_v1  ;;  %v976_v5 = vld [vmem:[#allocation5 + $0x28] sm:$0xff]   ;;  %v977_v6 = vld [vmem:[#allocation5 + $0x60] sm:$0xff]   ;;  %v979_v8 = vld [vmem:[#allocation5 + $0x58] sm:$0xff]   ;;  %s820_s28 = sshll.u32 (%p1445_p10), %s1220_s22, 2 }
  0x61   : > { %849 = vmatprep.subr.bf16.mxu0 %v973_v2  ;;  %v978_v7 = vld [vmem:[#allocation5 + $0x20] sm:$0xff]   ;;  %v980_v9 = vld [vmem:[#allocation5 + $0x18] sm:$0xff]   ;;  %v981_v10 = vld [vmem:[#allocation5 + $0x50] sm:$0xff]   ;;  %s667_s16 = ssub.s32 (%p1445_p10), 7, %s820_s28 }
  0x62   : > { %v293_v11 = vld [vmem:[%s1342_s12 + $0x8] sm:$0xff]  ;;  %v295_v12 = vld [vmem:[%s1342_s12 + $0x18] sm:$0xff]  ;;  %v982_v14 = vld [vmem:[#allocation5 + $0x10] sm:$0xff]   ;;  %p668_p1 = scmp.lt.s32.totalorder (%p1445_p10), %s667_s16, 4 }
  0x63   : > { %v301_v13 = vpack.c.bf16 %v295_v12, %v293_v11  ;;  %v983_v15 = vld [vmem:[#allocation5 + $0x48] sm:$0xff]   ;;  %v987_v16 = vld [vmem:[#allocation7 + $0x38] sm:$0xff]   ;;  %v988_v17 = vld [vmem:[#allocation7 + $0x30] sm:$0xff]  }
  0x64   : > { %850 = vmatpush3.bf16.msra.mxu0 %v974_v3  ;;  %v984_v18 = vld [vmem:[#allocation5 + $0x8] sm:$0xff]   ;;  %885 = vmatprep.subr.bf16.mxu1 %v987_v16  ;;  %v985_v20 = vld [vmem:[#allocation5 + $0x40] sm:$0xff]   ;;  %v294_v23 = vld [vmem:[%s1342_s12 + $0x10] sm:$0xff] }
  0x65   : > { %851 = vmatprep.subr.bf16.mxu0 %v975_v4  ;;  %471 = vmatprep.mubr.bf16.mxu0 %v301_v13  ;;  %v989_v19 = vld [vmem:[#allocation7 + $0x28] sm:$0xff]   ;;  %v986_v21 = vld [vmem:[#allocation5] sm:$0xff]   ;;  %v299_v25 = vld [vmem:[%s1342_s12 + $0x38] sm:$0xff] }
  0x66   : > { %886 = vmatpush3.bf16.msra.mxu1 %v987_v16  ;;  %v292_v22 = vld [vmem:[%s1342_s12] sm:$0xff]  ;;  %v297_v24 = vld [vmem:[%s1342_s12 + $0x28] sm:$0xff]  ;;  %v298_v29 = vld [vmem:[%s1342_s12 + $0x30] sm:$0xff] }
  0x67   : > { %887 = vmatprep.subr.bf16.mxu1 %v988_v17  ;;  %v300_v26 = vpack.c.bf16 %v294_v23, %v292_v22  ;;  %v303_v27 = vpack.c.bf16 %v299_v25, %v297_v24  ;;  %v296_v28 = vld [vmem:[%s1342_s12 + $0x20] sm:$0xff]  ;;  %v991_v32 = vld [vmem:[#allocation7 + $0x18] sm:$0xff]   ;;  %v992_v33 = vld [vmem:[#allocation7 + $0x10] sm:$0xff]  }
  0x68   : > { %852 = vmatpush3.bf16.msra.mxu0 %v976_v5  ;;  %v302_v30 = vpack.c.bf16 %v298_v29, %v296_v28  ;;  %v990_v31 = vld [vmem:[#allocation7 + $0x20] sm:$0xff]   ;;  %v993_v34 = vld [vmem:[#allocation7 + $0x8] sm:$0xff]  }
  0x69   : > { %853 = vmatprep.subr.bf16.mxu0 %v977_v6  ;;  %v994_v35 = vld [vmem:[#allocation7] sm:$0xff]  }
  0x6a   : > { %888 = vmatpush3.bf16.msra.mxu1 %v988_v17  ;;  %v789_v40 = vld [vmem:[%s1430_s2] ss:$0 sm:$0xff] }
  0x6b   : > { %889 = vmatprep.subr.bf16.mxu1 %v989_v19  ;;  %v806_v59 = vld [vmem:[%s1432_s4] ss:$0 sm:$0xff] }
  0x6c   : > { %854 = vmatpush3.bf16.msra.mxu0 %v978_v7 }
  0x6d   : > { %855 = vmatprep.subr.bf16.mxu0 %v979_v8 }
  0x6e   : > { %890 = vmatpush3.bf16.msra.mxu1 %v989_v19 }
  0x6f   : > { %891 = vmatprep.subr.bf16.mxu1 %v990_v31 }
  0x70   : > { %856 = vmatpush3.bf16.msra.mxu0 %v980_v9 }
  0x71   : > { %857 = vmatprep.subr.bf16.mxu0 %v981_v10 }
  0x72   : > { %892 = vmatpush3.bf16.msra.mxu1 %v990_v31 }
  0x73   : > { %893 = vmatprep.subr.bf16.mxu1 %v991_v32 }
  0x74   : > { %858 = vmatpush3.bf16.msra.mxu0 %v982_v14 }
  0x75   : > { %859 = vmatprep.subr.bf16.mxu0 %v983_v15 }
  0x76   : > { %894 = vmatpush3.bf16.msra.mxu1 %v991_v32 }
  0x77   : > { %895 = vmatprep.subr.bf16.mxu1 %v992_v33 }
  0x78   : > { %860 = vmatpush3.bf16.msra.mxu0 %v984_v18 }
  0x79   : > { %861 = vmatprep.subr.bf16.mxu0 %v985_v20 }
  0x7a   : > { %896 = vmatpush3.bf16.msra.mxu1 %v992_v33 }
  0x7b   : > { %897 = vmatprep.subr.bf16.mxu1 %v993_v34 }
  0x7c   : > { %862 = vmatpush3.bf16.msra.mxu0 %v986_v21 }
  0x7e   : > { %898 = vmatpush3.bf16.msra.mxu1 %v993_v34 }
  0x7f   : > { %472 = vmatmul.mubr.bf16.vlgmr.msra.gmra.mxu0 %v300_v26  ;;  %899 = vmatprep.subr.bf16.mxu1 %v994_v35 }
  0x80   : > { %479 = vmatprep.mubr.bf16.mxu0 %v303_v27 }
  0x82   : > { %900 = vmatpush3.bf16.msra.mxu1 %v994_v35 }
  0x87   : > { %480 = vmatmul.mubr.bf16.gmra.mxu0 %v302_v30 }
 0x13f   : > { %v863_v36 = vpop.f32.mrf.mxu0 }
 0x141   : > { %v864_v37 = vpop.f32.mrf.mxu0 }
 0x142   : > { %v865_v38 = vadd.f32 %v864_v37, %v863_v36 }
 0x143   : > { %v866_v39 = vpop.f32.mrf.mxu0 }
 0x144   : > { %v474_v43 = vadd.f32 %v865_v38, %v789_v40 }
 0x145   : > { %v867_v41 = vpop.f32.mrf.mxu0 }
 0x146   : > { %v868_v42 = vadd.f32 %v867_v41, %v866_v39  ;;  %v488_v48 = vmax.f32 %v474_v43, 0.0 }
 0x147   : > { %v869_v44 = vpop.f32.mrf.mxu0 }
 0x148   : > { %v477_v45 = vadd.f32 %v868_v42, %v789_v40 }
 0x149   : > { %v870_v46 = vpop.f32.mrf.mxu0 }
 0x14a   : > { %v871_v47 = vadd.f32 %v870_v46, %v869_v44  ;;  %v489_v49 = vmax.f32 %v477_v45, 0.0 }
 0x14b   : > { %v872_v50 = vpop.f32.mrf.mxu0 }
 0x14c   : > { %v492_v51 = vpack.c.bf16 %v489_v49, %v488_v48  ;;  %v482_v53 = vadd.f32 %v871_v47, %v789_v40 }
 0x14d   : > { %v873_v52 = vpop.f32.mrf.mxu0 }
 0x14e   : > { %v874_v54 = vadd.f32 %v873_v52, %v872_v50  ;;  %901 = vmatprep.mubr.bf16.mxu1 %v492_v51  ;;  %v490_v56 = vmax.f32 %v482_v53, 0.0 }
 0x150   : > { %v485_v55 = vadd.f32 %v874_v54, %v789_v40 }
 0x152   : > { %v491_v57 = vmax.f32 %v485_v55, 0.0 }
 0x154   : > { %v493_v58 = vpack.c.bf16 %v491_v57, %v490_v56 }
 0x156   : > { %902 = vmatmul.mubr.bf16.vlgmr.msra.gmra.mxu1 %v493_v58 }
 0x216   : > { %v903_v60 = vpop.f32.mrf.mxu1 }
 0x217   : > { %v608_v61 = vadd.f32 %v903_v60, %v806_v59 }
 0x218   : > { %v599_v62 = vpop.f32.mrf.mxu1 }
 0x219   : > { %v616_v63 = vmul.f32 0.5, %v608_v61  ;;  %v600_v0 = vadd.f32 %v806_v59, %v599_v62 }
 0x21a   : > { %v904_v1 = vpop.f32.mrf.mxu1 }
 0x21b   : > { %995 = vtanh.f32 %v616_v63  ;;  %v614_v2 = vmul.f32 0.5, %v600_v0  ;;  %v611_v3 = vadd.f32 %v904_v1, %v806_v59 }
 0x21c   : > { %v602_v4 = vpop.f32.mrf.mxu1 }
 0x21d   : > { %997 = vtanh.f32 %v614_v2  ;;  %v617_v5 = vmul.f32 0.5, %v611_v3  ;;  %v603_v6 = vadd.f32 %v806_v59, %v602_v4 }
 0x21f   : > { %999 = vtanh.f32 %v617_v5  ;;  %v615_v7 = vmul.f32 0.5, %v603_v6 }
 0x221   : > { %1001 = vtanh.f32 %v615_v7 }
 0x222   : > { %1003 = vtanh.f32 %v608_v61 }
 0x223   : > { %1005 = vtanh.f32 %v611_v3 }
 0x224   : > { %1007 = vtanh.f32 %v600_v0 }
 0x225   : > { %1009 = vtanh.f32 %v603_v6 }
 0x228   : > { %v996_v8 = vpop.eup %995 }
 0x229   : > { %v624_v9 = vmul.f32 0.5, %v996_v8 }
 0x22a   : > { %v998_v10 = vpop.eup %997 }
 0x22b   : > { %v622_v11 = vmul.f32 0.5, %v998_v10  ;;  %v628_v13 = vadd.f32 0.5, %v624_v9 }
 0x22c   : > { %v1000_v12 = vpop.eup %999 }
 0x22d   : > { %v625_v14 = vmul.f32 0.5, %v1000_v12  ;;  %v626_v17 = vadd.f32 0.5, %v622_v11 }
 0x22e   : > { %v1002_v15 = vpop.eup %1001 }
 0x22f   : > { %v1004_v16 = vpop.eup %1003  ;;  %v629_v18 = vadd.f32 0.5, %v625_v14  ;;  %v623_v19 = vmul.f32 0.5, %v1002_v15 }
 0x230   : > { %v1006_v20 = vpop.eup %1005  ;;  %v636_v22 = vadd.f32 %v1004_v16, %v628_v13 }
 0x231   : > { %v1008_v21 = vpop.eup %1007  ;;  %v637_v23 = vadd.f32 %v1006_v20, %v629_v18  ;;  %v627_v24 = vadd.f32 0.5, %v623_v19 }
 0x232   : > { %v1010_v25 = vpop.eup %1009  ;;  %v634_v26 = vadd.f32 %v1008_v21, %v626_v17 }
 0x233   : > { %v844_v27 = vpack.c.bf16 %v637_v23, %v636_v22  ;;  %v635_v28 = vadd.f32 %v1010_v25, %v627_v24  ;;  %665 = sbr.rel (!%p1445_p10) target bundleno = 595 (0x253), region = 56 }
 0x235   : > { %846 = vst [vmem:[%s279_s25 + $0x8] sm:$0xff] %v844_v27   ;;  %v839_v29 = vpack.c.bf16 %v635_v28, %v634_v26 }
 0x237   : > { %840 = vst [vmem:[%s279_s25] sm:$0xff] %v839_v29  }
 0x238   : > { %s1454_s16 = smov (!%p668_p1, %s667_s16), 4 }
 0x239   : > { %s1371_s17 = sshll.u32 %s1454_s16, 6 }
 0x23a   : > { %s672_s26 = ssub.s32 256, %s1371_s17 }
 0x23b   : > { %673 = vsyncadd %s659_s15, %s672_s26  ;;  %p822_p3 = scmp.ne.s32.totalorder %s1371_s17, 0  ;;  %s835_s8 = sshll.u32 %s1220_s22, 8 }
 0x23c   : > { %s1381_s13 = scalar_lea.hbm %s1433_s5, %s835_s8  ;;  %s678_s12 = sshll.u32 %s279_s25, 4  ;;  %s1383_s12 = int_to_ptr.vmem [resolvable:$true] %s678_s12 }
 0x23d   : > { %s1089_s29 = scalar_lea.vmem %s1383_s12, %s1371_s17  ;;  %s1166_s7 = smov [#allocation8]  }
 0x23e   : > { %p1090_p7 = scmp.ne.s32.totalorder %s1383_s12, %s1089_s29  ;;  %s1093_s10 = sshll.u32 %s1166_s7, 4  ;;  %s1094_s10 = int_to_ptr.vmem [resolvable:$false] %s1093_s10 }
 0x23f   : > { %s1095_s22 = scalar_lea.vmem %s1094_s10, 512  ;;  %p1096_p4 = scmp.lt.s32.totalorder %s1383_s12, %s1094_s10 }
 0x240   : > { %p1091_p9 = pnand %p1090_p7, %p822_p3  ;;  %p1097_p6 = scmp.lt.s32.totalorder %s1095_s22, %s1089_s29 }
 0x242   : > { %p1092_p12 = pneg %p1091_p9  ;;  %p1098_p11 = por %p1097_p6, %p1096_p4 }
 0x244   : > { %p1099_p0 = pnand %p1098_p11, %p1092_p12 }
 0x246   : > { %1102 = shalt.err (!%p1099_p0)
}
 0x247   : > { %s1103_s14 = scalar_lea.hbm %s1381_s13, %s1371_s17  ;;  %s1107_s28 = scalar_lea.hbm %s1433_s5, 448 }
 0x248   : > { %p1104_p2 = scmp.ne.s32.totalorder %s1381_s13, %s1103_s14  ;;  %p1108_p10 = scmp.lt.s32.totalorder %s1381_s13, %s1433_s5 }
 0x249   : > { %p1109_p1 = scmp.lt.s32.totalorder %s1107_s28, %s1103_s14 }
 0x24a   : > { %p1105_p5 = pnand %p1104_p2, %p822_p3 }
 0x24b   : > { %p1110_p7 = por %p1109_p1, %p1108_p10 }
 0x24c   : > { %p1106_p13 = pneg %p1105_p5 }
 0x24e   : > { %p1111_p9 = pnand %p1110_p7, %p1106_p13 }
 0x250   : > { %1114 = shalt.err (!%p1111_p9)
}
 0x251   : > { %s1167_s8 = smov 64   ;;  %s1168_s30 = smov 4  }
 0x252   : > { %684 = dma.vmem_to_hbm [thread:$0]  (%p822_p3), %s1383_s12, %s1371_s17, %s1381_s13, %s659_s15, %s1167_s8, %s1167_s8, %s1168_s30  }
 0x253 PF: > { %s693_s11 = sand.u32 1, %s1145_s18   ;;  %p1446_p12 = scmp.ne.s32.totalorder %s1439_s6, 0 }
 0x254   : > { %s694_s29 = scalar_lea.sflag [#allocation4], %s693_s11 }
 0x255   : > { %p923_p4 = pnand %p774_p8, %p1446_p12 }
 0x257   : > { %p924_p6 = pneg %p923_p4 }
 0x259   : > { %1140 = dma.done.wait (%p924_p6), %s694_s29, 256  }
 0x25a   : > { %1142 = vsyncadd (%p924_p6), %s694_s29, 4294967040  ;;  %p19_p11 = scmp.ge.s32.totalorder %s1224_s24, 4   ;;  %s1447_s18 = smov %s1149_s19 }
 0x25b   : > { %s1448_s19 = smov %s1153_s20  ;;  %s1449_s20 = smov %s1236_s27 }
 0x25c   : > { %s1450_s21 = smov %s1224_s24  ;;  %21 = sbr.rel (!%p19_p11) target bundleno = 6 (0x6), region = 93 }
 0x261   :  { %699 = vsyncpa [#allocation3], 1 }
 0x262   :  { %701 = vsyncpa [#allocation3 + $0x1], 1 }
 0x263   :  { %702 = vsyncpa [#allocation6], 1 }
 0x264   :  { %703 = vsyncpa [#allocation4], 1 }
 0x265   :  { %705 = vsyncpa [#allocation4 + $0x1], 1 }

</bundles_post_ra>
